<compile_context>
chip_gen: v6e
topology: v6e:2x2x1
jax: 0.10.0
libtpu: 0.0.40
codegen_flags: <defaults>
</compile_context>

<pallas_src>
import itertools
import functools

import numpy as np
import jax
import jax.numpy as jnp
from jax.experimental import pallas as pl
from jax.experimental.pallas import tpu as pltpu


def _round_up(x, m):
    return ((x + m - 1) // m) * m


# ----------------------------------------------------------------------------
# Partition table: group-0 membership mask for every partition of the estimated
# sources into 2 groups (asteroid best_part_mixit_generalized); group 1 is the
# complement.  Shape (2**n_src, n_src).
# ----------------------------------------------------------------------------
def make_mixit_partitions_group0(n_src):
    rows = []
    for k in range(n_src + 1):
        for c in itertools.combinations(range(n_src), k):
            g0 = np.zeros((n_src,), np.float32)
            g0[list(c)] = 1.0
            rows.append(g0)
    return np.stack(rows, axis=0)


# ----------------------------------------------------------------------------
# Fused kernel: one pass over D tiles producing
#   l1_ref  : (1, 1, d_tile)  per-tile lane-dense partial sums of |est - y|
#   mix_ref : (1, B, P)       per-tile per-(batch, partition) MixIT partial sums
# ----------------------------------------------------------------------------
def _fused_loss_kernel(parts_ref, tmask_ref, est_ref, y_ref, l1_ref, mix_ref,
                       *, d_total, d_tile, compute_l1, compute_mixit):
    est = est_ref[...].astype(jnp.float32)          # (B, S,  d)
    y = y_ref[...].astype(jnp.float32)              # (B, St, d)

    # Ragged-tail masking (only emitted when D is not a multiple of d_tile).
    if d_total % d_tile != 0:
        start = pl.program_id(0) * d_tile
        lane = jax.lax.broadcasted_iota(jnp.int32, (1, 1, d_tile), 2)
        m = lane < (d_total - start)                # (1, 1, d) bool
        est = jnp.where(m, est, 0.0)
        y = jnp.where(m, y, 0.0)

    # ---- L1 branch: sum |est - y| over (B, S) -> lane-dense (1, 1, d) row.
    if compute_l1:
        l1_ref[...] = jnp.sum(jnp.abs(est - y), axis=(0, 1), keepdims=True)
    else:
        l1_ref[...] = jnp.zeros_like(l1_ref)

    # ---- MixIT branch: all 2^S partitions via one batched dot_general.
    if compute_mixit:
        n_batch = est.shape[0]
        A0 = jnp.broadcast_to(parts_ref[...][None],
                              (n_batch,) + parts_ref.shape)     # (B, P, S)
        tm = jnp.broadcast_to(tmask_ref[...][None],
                              (n_batch,) + tmask_ref.shape)     # (B, 2, St)
        # group-0 mixture of est sources for every partition: (B, P, d)
        mix0 = jnp.einsum('bps,bsd->bpd', A0, est,
                          preferred_element_type=jnp.float32)
        # the two target mixtures from the permutation mask: (B, 2, d)
        tar = jnp.einsum('bms,bsd->bmd', tm, y,
                         preferred_element_type=jnp.float32)
        total = jnp.sum(est, axis=1, keepdims=True)             # (B, 1, d)
        d0 = jnp.abs(mix0 - tar[:, 0:1, :])                     # (B, P, d)
        d1 = jnp.abs((total - mix0) - tar[:, 1:2, :])           # (B, P, d)
        mix_ref[...] = jnp.sum(d0 + d1, axis=-1)[None]          # (1, B, P)
    else:
        mix_ref[...] = jnp.zeros_like(mix_ref)


def fused_loss_partials_pallas(y_hat, y, parts_g0, tmask, *, compute_l1,
                               compute_mixit, d_tile_max=32768,
                               vmem_budget_bytes=12 * 1024 * 1024):
    """Stream y_hat / y once; return (L1 partial sums, MixIT partial sums)."""
    B, S = y_hat.shape[0], y_hat.shape[1]
    St = y.shape[1]
    D = int(np.prod(y_hat.shape[2:]))
    assert int(np.prod(y.shape[2:])) == D
    P = parts_g0.shape[0]

    est2 = y_hat.reshape(B, S, D)        # free reshapes (contiguous), no padding
    tar2 = y.reshape(B, St, D)

    # Conservative per-lane f32 word estimate: double-buffered inputs + f32 copies
    # + mix0/d0/d1 temporaries + target/total + L1 diff.  Works on v5e/v6e/v7x.
    per_d_words = 3 * (B * S + B * St) + 3 * B * P + 3 * B + B * S
    d_cap = max(128, (vmem_budget_bytes // (4 * per_d_words)) // 128 * 128)
    d_tile = int(min(d_tile_max, d_cap, _round_up(D, 128)))
    G = (D + d_tile - 1) // d_tile

    kernel = functools.partial(_fused_loss_kernel, d_total=D, d_tile=d_tile,
                               compute_l1=compute_l1, compute_mixit=compute_mixit)

    l1_part, mix_part = pl.pallas_call(
        kernel,
        out_shape=(jax.ShapeDtypeStruct((G, 1, d_tile), jnp.float32),
                   jax.ShapeDtypeStruct((G, B, P), jnp.float32)),
        grid_spec=pltpu.PrefetchScalarGridSpec(
            num_scalar_prefetch=0,
            grid=(G,),
            in_specs=[
                pl.BlockSpec(tuple(parts_g0.shape), lambda g: (0, 0)),   # DMA'd once
                pl.BlockSpec(tuple(tmask.shape), lambda g: (0, 0)),      # DMA'd once
                pl.BlockSpec((B, S, d_tile), lambda g: (0, 0, g)),
                pl.BlockSpec((B, St, d_tile), lambda g: (0, 0, g)),
            ],
            out_specs=(
                pl.BlockSpec((1, 1, d_tile), lambda g: (g, 0, 0)),
                pl.BlockSpec((1, B, P), lambda g: (g, 0, 0)),
            ),
        ),
        compiler_params=pltpu.CompilerParams(
            dimension_semantics=("parallel",),        # per-step outputs -> no races,
                                                      # v7x megacore shards the axis
            vmem_limit_bytes=32 * 1024 * 1024,        # explicit; safe on v5e & v7x
        ),
    )(parts_g0, tmask, est2, tar2)
    return l1_part, mix_part


# ----------------------------------------------------------------------------
# Forward pass of MixITnL1nMeanTeacher
# ----------------------------------------------------------------------------
def mixit_l1_mean_teacher_forward(outputs, targets, key, ema_model=None,
                                  weights=None, mean_teacher_enable=False,
                                  d_tile_max=32768):
    if weights is None:
        weights = [1, 0, 0]
    y_hat = outputs['y_hat']
    y = targets['y']
    B, S = y_hat.shape[0], y_hat.shape[1]
    St = y.shape[1]
    D = int(np.prod(y_hat.shape[2:]))

    compute_l1 = weights[0] != 0
    compute_mixit = weights[1] != 0
    if compute_l1:
        assert y_hat.shape == y.shape, "l1_loss branch needs matching shapes"

    if compute_mixit:
        assert St >= 2, "MixIT branch needs at least 2 target sources"
        # torch.randperm equivalent (glue): permute target sources, first two ->
        # mixture 0, remainder -> mixture 1, encoded as a (2, St) 0/1 mask.
        perm = jax.random.permutation(key, St)
        tmask = (jnp.zeros((2, St), jnp.float32)
                 .at[0, perm[:2]].set(1.0)
                 .at[1, perm[2:]].set(1.0))
        parts_g0 = jnp.asarray(make_mixit_partitions_group0(S), jnp.float32)
    else:
        tmask = jnp.zeros((2, St), jnp.float32)
        parts_g0 = jnp.zeros((1, S), jnp.float32)

    loss = jnp.float32(0.0)
    if compute_l1 or compute_mixit:
        l1_part, mix_part = fused_loss_partials_pallas(
            y_hat, y, parts_g0, tmask,
            compute_l1=compute_l1, compute_mixit=compute_mixit,
            d_tile_max=d_tile_max)
        if compute_l1:
            loss = loss + weights[0] * (jnp.sum(l1_part) / jnp.float32(B * S * D))
        if compute_mixit:
            loss_set = jnp.sum(mix_part, axis=0) / jnp.float32(2 * D)   # (B, P)
            loss = loss + weights[1] * jnp.mean(jnp.min(loss_set, axis=1))

    if weights[2] != 0 and ema_model is not None and mean_teacher_enable:
        # TODO(synk): mean-teacher branch requires ema_model.separate(...) (external
        # separation network forward under inference mode); no self-contained equivalent.
        pass

    return loss / sum(weights)


# ----------------------------------------------------------------------------
# Pure-JAX reference (correctness check)
# ----------------------------------------------------------------------------
def ref_forward(outputs, targets, key, weights):
    y_hat = outputs['y_hat']
    y = targets['y']
    total = jnp.float32(0.0)
    if weights[0] != 0:
        total = total + weights[0] * jnp.mean(jnp.abs(y_hat - y))
    if weights[1] != 0:
        St = y.shape[1]
        perm = jax.random.permutation(key, St)
        tar = jnp.stack([jnp.take(y, perm[:2], axis=1).sum(1),
                         jnp.take(y, perm[2:], axis=1).sum(1)], axis=1)
        g0 = make_mixit_partitions_group0(y_hat.shape[1])                  # (P, S)
        parts = jnp.asarray(np.stack([g0, 1.0 - g0], axis=1))              # (P, 2, S)
        mixes = jnp.einsum('pms,bsct->pbmct', parts, y_hat)
        loss_set = jnp.mean(jnp.abs(mixes - tar[None]), axis=(2, 3, 4))    # (P, B)
        total = total + weights[1] * jnp.mean(jnp.min(loss_set, axis=0))
    return total / sum(weights)


if __name__ == "__main__":
    key = jax.random.PRNGKey(0)
    k1, k2, k3 = jax.random.split(key, 3)
    weights = [0.7, 0.3, 0.0]     # exercise both the L1 and the MixIT branches

    # Case 1: D = C*T multiple of 128 (no-mask fast path, single tile).
    B, S, C, T = 2, 4, 2, 64
    y_hat = jax.random.normal(k1, (B, S, C, T), jnp.float32)
    y = jax.random.normal(k2, (B, S, C, T), jnp.float32)
    out = mixit_l1_mean_teacher_forward({'y_hat': y_hat}, {'y': y}, k3, weights=weights)
    out = jax.block_until_ready(out)
    ref = jax.block_until_ready(ref_forward({'y_hat': y_hat}, {'y': y}, k3, weights))
    np.testing.assert_allclose(np.asarray(out), np.asarray(ref), rtol=1e-5, atol=1e-5)

    # Case 2: ragged D (not a multiple of 128) and multiple D tiles (masked tail).
    B, S, C, T = 2, 4, 2, 200     # D = 400 -> 4 tiles of 128, 16-wide masked tail
    y_hat = jax.random.normal(k1, (B, S, C, T), jnp.float32)
    y = jax.random.normal(k2, (B, S, C, T), jnp.float32)
    out = mixit_l1_mean_teacher_forward({'y_hat': y_hat}, {'y': y}, k3,
                                        weights=weights, d_tile_max=128)
    out = jax.block_until_ready(out)
    ref = jax.block_until_ready(ref_forward({'y_hat': y_hat}, {'y': y}, k3, weights))
    np.testing.assert_allclose(np.asarray(out), np.asarray(ref), rtol=1e-5, atol=1e-5)

    print("KERNEL_OK")
</pallas_src>

<mosaic_0001>
module attributes {stable_mosaic.version = 11 : i64} {
  func.func @_fused_loss_kernel(%arg0: i32, %arg1: memref<16x4xf32, #tpu.memory_space<vmem>>, %arg2: memref<2x4xf32, #tpu.memory_space<vmem>>, %arg3: memref<2x4x128xf32, #tpu.memory_space<vmem>>, %arg4: memref<2x4x128xf32, #tpu.memory_space<vmem>>, %arg5: memref<1x1x128xf32, #tpu.memory_space<vmem>>, %arg6: memref<1x2x16xf32, #tpu.memory_space<vmem>>) attributes {dimension_semantics = [#tpu.dimension_semantics<parallel>], iteration_bounds = array<i64: 1>, scalar_prefetch = 0 : i64, scratch_operands = 0 : i64, tpu.core_type = #tpu.core_type<tc>, window_params = [{pipeline_mode = #tpu.pipeline_mode<synchronous>, transform_indices = @transform_0, window_bounds = array<i64: 16, 4>}, {pipeline_mode = #tpu.pipeline_mode<synchronous>, transform_indices = @transform_1, window_bounds = array<i64: 2, 4>}, {transform_indices = @transform_2, window_bounds = array<i64: 2, 4, 128>}, {transform_indices = @transform_3, window_bounds = array<i64: 2, 4, 128>}, {transform_indices = @transform_4, window_bounds = array<i64: 1, 1, 128>}, {transform_indices = @transform_5, window_bounds = array<i64: 1, 2, 16>}]} {
    %c0 = arith.constant 0 : index
    %c0_0 = arith.constant 0 : index
    %c0_1 = arith.constant 0 : index
    %0 = vector.load %arg3[%c0, %c0_0, %c0_1] : memref<2x4x128xf32, #tpu.memory_space<vmem>>, vector<2x4x128xf32>
    %c0_2 = arith.constant 0 : index
    %c0_3 = arith.constant 0 : index
    %c0_4 = arith.constant 0 : index
    %1 = vector.load %arg4[%c0_2, %c0_3, %c0_4] : memref<2x4x128xf32, #tpu.memory_space<vmem>>, vector<2x4x128xf32>
    %2 = arith.subf %0, %1 : vector<2x4x128xf32>
    %3 = math.absf %2 : vector<2x4x128xf32>
    %cst = arith.constant dense<0.000000e+00> : vector<128xf32>
    %4 = vector.multi_reduction <add>, %3, %cst [0, 1] : vector<2x4x128xf32> to vector<128xf32>
    %5 = vector.shape_cast %4 : vector<128xf32> to vector<1x1x128xf32>
    %c0_5 = arith.constant 0 : index
    %c0_6 = arith.constant 0 : index
    %c0_7 = arith.constant 0 : index
    %6 = vector.load %arg5[%c0_5, %c0_6, %c0_7] : memref<1x1x128xf32, #tpu.memory_space<vmem>>, vector<1x1x128xf32>
    tpu.vector_store %arg5[%c0_5, %c0_6, %c0_7], %5 {strides = array<i32>} : memref<1x1x128xf32, #tpu.memory_space<vmem>>, vector<1x1x128xf32>,
    %c0_8 = arith.constant 0 : index
    %c0_9 = arith.constant 0 : index
    %7 = vector.load %arg1[%c0_8, %c0_9] : memref<16x4xf32, #tpu.memory_space<vmem>>, vector<16x4xf32>
    %8 = vector.shape_cast %7 : vector<16x4xf32> to vector<1x16x4xf32>
    %9 = vector.shape_cast %8 : vector<1x16x4xf32> to vector<1x16x4xf32>
    %10 = vector.broadcast %9 : vector<1x16x4xf32> to vector<2x16x4xf32>
    %c0_10 = arith.constant 0 : index
    %c0_11 = arith.constant 0 : index
    %11 = vector.load %arg2[%c0_10, %c0_11] : memref<2x4xf32, #tpu.memory_space<vmem>>, vector<2x4xf32>
    %12 = vector.shape_cast %11 : vector<2x4xf32> to vector<1x2x4xf32>
    %13 = vector.shape_cast %12 : vector<1x2x4xf32> to vector<1x2x4xf32>
    %14 = vector.broadcast %13 : vector<1x2x4xf32> to vector<2x2x4xf32>
    "tpu.trace_start"() <{level = 10 : i32, message = "bps,bsd->bpd"}> : () -> ()
    %cst_12 = arith.constant dense<0.000000e+00> : vector<2x16x128xf32>
    %15 = tpu.matmul %10, %0, %cst_12 {dimension_numbers = #tpu.dot_dimension_numbers<[2], [1], [1], [2], [0, 0, 0, 1, 1, 2], [0], [0]>} : vector<2x16x4xf32>, vector<2x4x128xf32>, vector<2x16x128xf32> -> vector<2x16x128xf32>
    "tpu.trace_stop"() : () -> ()
    "tpu.trace_start"() <{level = 10 : i32, message = "bms,bsd->bmd"}> : () -> ()
    %cst_13 = arith.constant dense<0.000000e+00> : vector<2x2x128xf32>
    %16 = tpu.matmul %14, %1, %cst_13 {dimension_numbers = #tpu.dot_dimension_numbers<[2], [1], [1], [2], [0, 0, 0, 1, 1, 2], [0], [0]>} : vector<2x2x4xf32>, vector<2x4x128xf32>, vector<2x2x128xf32> -> vector<2x2x128xf32>
    "tpu.trace_stop"() : () -> ()
    %cst_14 = arith.constant dense<0.000000e+00> : vector<2x128xf32>
    %17 = vector.multi_reduction <add>, %0, %cst_14 [1] : vector<2x4x128xf32> to vector<2x128xf32>
    %18 = vector.shape_cast %17 : vector<2x128xf32> to vector<2x1x128xf32>
    %19 = vector.extract_strided_slice %16 {offsets = [0, 0, 0], sizes = [2, 1, 128], strides = [1, 1, 1]} : vector<2x2x128xf32> to vector<2x1x128xf32>
    %20 = vector.broadcast %19 : vector<2x1x128xf32> to vector<2x16x128xf32>
    %21 = arith.subf %15, %20 : vector<2x16x128xf32>
    %22 = math.absf %21 : vector<2x16x128xf32>
    %23 = vector.broadcast %18 : vector<2x1x128xf32> to vector<2x16x128xf32>
    %24 = arith.subf %23, %15 : vector<2x16x128xf32>
    %25 = vector.extract_strided_slice %16 {offsets = [0, 1, 0], sizes = [2, 1, 128], strides = [1, 1, 1]} : vector<2x2x128xf32> to vector<2x1x128xf32>
    %26 = vector.broadcast %25 : vector<2x1x128xf32> to vector<2x16x128xf32>
    %27 = arith.subf %24, %26 : vector<2x16x128xf32>
    %28 = math.absf %27 : vector<2x16x128xf32>
    %29 = arith.addf %22, %28 : vector<2x16x128xf32>
    %cst_15 = arith.constant dense<0.000000e+00> : vector<2x16xf32>
    %30 = vector.multi_reduction <add>, %29, %cst_15 [2] : vector<2x16x128xf32> to vector<2x16xf32>
    %31 = vector.shape_cast %30 : vector<2x16xf32> to vector<1x2x16xf32>
    %c0_16 = arith.constant 0 : index
    %c0_17 = arith.constant 0 : index
    %c0_18 = arith.constant 0 : index
    %32 = vector.load %arg6[%c0_16, %c0_17, %c0_18] : memref<1x2x16xf32, #tpu.memory_space<vmem>>, vector<1x2x16xf32>
    tpu.vector_store %arg6[%c0_16, %c0_17, %c0_18], %31 {strides = array<i32>} : memref<1x2x16xf32, #tpu.memory_space<vmem>>, vector<1x2x16xf32>,
    return
  }
  func.func @transform_0(%arg0: i32) -> (i32, i32) {
    %c0_i32 = arith.constant 0 : i32
    %c0_i32_0 = arith.constant 0 : i32
    %c0_i32_1 = arith.constant 0 : i32
    return %c0_i32, %c0_i32_0 : i32, i32
  }
  func.func @transform_1(%arg0: i32) -> (i32, i32) {
    %c0_i32 = arith.constant 0 : i32
    %c0_i32_0 = arith.constant 0 : i32
    %c0_i32_1 = arith.constant 0 : i32
    return %c0_i32, %c0_i32_0 : i32, i32
  }
  func.func @transform_2(%arg0: i32) -> (i32, i32, i32) {
    %c0_i32 = arith.constant 0 : i32
    %c0_i32_0 = arith.constant 0 : i32
    %c0_i32_1 = arith.constant 0 : i32
    return %c0_i32, %c0_i32_0, %arg0 : i32, i32, i32
  }
  func.func @transform_3(%arg0: i32) -> (i32, i32, i32) {
    %c0_i32 = arith.constant 0 : i32
    %c0_i32_0 = arith.constant 0 : i32
    %c0_i32_1 = arith.constant 0 : i32
    return %c0_i32, %c0_i32_0, %arg0 : i32, i32, i32
  }
  func.func @transform_4(%arg0: i32) -> (i32, i32, i32) {
    %c0_i32 = arith.constant 0 : i32
    %c0_i32_0 = arith.constant 0 : i32
    %c0_i32_1 = arith.constant 0 : i32
    return %arg0, %c0_i32, %c0_i32_0 : i32, i32, i32
  }
  func.func @transform_5(%arg0: i32) -> (i32, i32, i32) {
    %c0_i32 = arith.constant 0 : i32
    %c0_i32_0 = arith.constant 0 : i32
    %c0_i32_1 = arith.constant 0 : i32
    return %arg0, %c0_i32, %c0_i32_0 : i32, i32, i32
  }
}

</mosaic_0001>

<bundles_post_ra>
// kernel: tpu_custom_call.1
= control target key start
LH: loop header
LB: loop body
LE: loop exit
PB: predicated region body
PF: predicated region fallthrough
CT: control target
= control target key end

     0   :  { %11 = vsyncpa [#allocation3], 0  ;;  %vm29_vm0 = vcmask 1043456   ;;  %vm43_vm1 = vcmask 31744   ;;  %s675_s0 = inlined_call_operand.vmem [shape: f32[16,4], index: 0, kind: input, shape index: {}]   ;;  %s676_s1 = inlined_call_operand.vmem [shape: f32[2,4], index: 1, kind: input, shape index: {}]   ;;  %s677_s2 = inlined_call_operand.vmem [shape: f32[2,4,128], index: 2, kind: input, shape index: {}]   ;;  %s678_s3 = inlined_call_operand.vmem [shape: f32[2,4,128], index: 3, kind: input, shape index: {}]   ;;  %s679_s4 = inlined_call_operand.hbm [shape: f32[1,1,128], index: 4, kind: output, shape index: {0}]   ;;  %s680_s5 = inlined_call_operand.hbm [shape: f32[1,2,16], index: 5, kind: output, shape index: {1}]  }
   0x1   :  { %v601_v0 = vld [vmem:[%s677_s2] sm:$0xf]  ;;  %v606_v1 = vld [vmem:[%s677_s2 + $0x4] sm:$0xf]  ;;  %v41_v3 = vld [vmem:[%s675_s0 + $0x8] sm:$0xff] }
   0x2   :  { %v40_v2 = vld [vmem:[%s675_s0] sm:$0xff]  ;;  %496 = vmatprep.subr.msk.mxu0 %vm29_vm0, %v601_v0  ;;  %501 = vmatprep.subr.msk.mxu1 %vm29_vm0, %v606_v1 }
   0x3   :  { %497 = vmatpush3.msk.msra.mxu0 %vm29_vm0, %v601_v0  ;;  %498 = vmatprep.mubr.msk.f32.mxu0 %vm43_vm1, %v40_v2  ;;  %v624_v4 = vld [vmem:[%s678_s3] sm:$0xf]  ;;  %v629_v5 = vld [vmem:[%s678_s3 + $0x4] sm:$0xf] }
   0x4   :  { %502 = vmatpush3.msk.msra.mxu1 %vm29_vm0, %v606_v1  ;;  %503 = vmatprep.mubr.msk.f32.mxu1 %vm43_vm1, %v40_v2  ;;  %v25_v6 = vsub.f32 %v601_v0, %v624_v4  ;;  %v26_v7 = vsub.f32 %v606_v1, %v629_v5 }
   0x5   :  { %12 = vsyncpa [#allocation5], 0  ;;  %499 = vmatmul.mubr.msk.f32.vlgmr.msra.gmra.mxu0 %vm43_vm1, %v41_v3  ;;  %504 = vmatmul.mubr.msk.f32.vlgmr.msra.gmra.mxu1 %vm43_vm1, %v41_v3  ;;  %v564_v8 = vmov 0.0   ;;  %v42_v9 = vld [vmem:[%s676_s1] sm:$0x3]  ;;  %vm565_vm2 = vmmov 0   ;;  %v369_v19 = vlaneseq }
   0x6   :  { %506 = vmatprep.subr.mxu0 %v564_v8  ;;  %511 = vmatprep.subr.mxu1 %v564_v8  ;;  %v362_v10 = vsel %vm29_vm0, %v606_v1, 0.0  ;;  %v355_v11 = vsel %vm29_vm0, %v601_v0, 0.0  ;;  %v27_v62 = vand.u32 2147483647, %v25_v6  ;;  %v28_v63 = vand.u32 2147483647, %v26_v7 }
   0x7   :  { %507 = vmatpush3.msk.msra.mxu0 %vm29_vm0, %v624_v4  ;;  %512 = vmatpush3.msk.msra.mxu1 %vm29_vm0, %v629_v5  ;;  %v363_v12 = vrot.slane %v362_v10, 4  ;;  %v356_v13 = vrot.slane %v355_v11, 4  ;;  %v654_v22 = vshrl.u32 %v369_v19, 7  ;;  %s566_s1 = smov [#allocation2]  }
   0x8   :  { %508 = vmatprep.mubr.msk.f32.mxu0 %vm565_vm2, %v564_v8  ;;  %513 = vmatprep.mubr.msk.f32.mxu1 %vm565_vm2, %v564_v8  ;;  %v30_v8 = vsel %vm29_vm0, %v27_v62, 0.0  ;;  %s454_s29 = sshll.u32 %s566_s1, 4  ;;  %s455_s29 = int_to_ptr.vmem [resolvable:$true] %s454_s29 }
   0x9   :  { %509 = vmatmul.mubr.msk.f32.vlgmr.msra.gmra.mxu0 %vm43_vm1, %v42_v9  ;;  %514 = vmatmul.mubr.msk.f32.vlgmr.msra.gmra.mxu1 %vm43_vm1, %v42_v9  ;;  %v364_v14 = vadd.f32 %v363_v12, %v362_v10  ;;  %v357_v15 = vadd.f32 %v356_v13, %v355_v11  ;;  %v371_v27 = vsub.s32 0, %v654_v22  ;;  %v391_v28 = vsub.s32 1, %v654_v22  ;;  %s520_s30 = scalar_lea.vmem %s455_s29, 16  ;;  %s524_s6 = scalar_lea.vmem %s455_s29, 32 }
   0xa   :  { %v31_v9 = vsel %vm29_vm0, %v28_v63, 0.0  ;;  %p521_p0 = scmp.ne.s32.totalorder %s455_s29, %s520_s30  ;;  %p525_p1 = scmp.lt.s32.totalorder %s455_s29, %s455_s29 }
   0xb   :  { %v365_v16 = vrot.slane %v364_v14, 2  ;;  %v358_v17 = vrot.slane %v357_v15, 2  ;;  %v32_v10 = vadd.f32 %v31_v9, %v30_v8  ;;  %p526_p2 = scmp.lt.s32.totalorder %s524_s6, %s520_s30 }
   0xd   :  { %v366_v18 = vadd.f32 %v365_v16, %v364_v14  ;;  %v359_v20 = vadd.f32 %v358_v17, %v357_v15  ;;  %v33_v11 = vrot.slane %v32_v10, 4  ;;  %p527_p3 = por %p526_p2, %p525_p1 }
   0xf   :  { %v367_v21 = vrot.slane %v366_v18, 1  ;;  %v360_v23 = vrot.slane %v359_v20, 1  ;;  %v34_v12 = vadd.f32 %v33_v11, %v32_v10  ;;  %p528_p4 = pnand %p527_p3, %p521_p0 }
  0x11   :  { %v368_v26 = vadd.f32 %v367_v21, %v366_v18  ;;  %v361_v31 = vadd.f32 %v360_v23, %v359_v20  ;;  %v35_v13 = vrot.slane %v34_v12, 2 }
  0x13   :  { %v36_v0 = vadd.f32 %v35_v13, %v34_v12 }
  0x15   :  { %v37_v4 = vrot.slane %v36_v0, 1 }
  0x17   :  { %v38_v1 = vadd.f32 %v37_v4, %v36_v0 }
  0x19   :  { %39 = vst [vmem:[#allocation2] sm:$0x1] %v38_v1 }
  0xc5   :  { %v500_v24 = vpop.f32.mrf.mxu0  ;;  %v505_v25 = vpop.f32.mrf.mxu1 }
  0xc6   :  { %v388_v32 = vsub.f32 %v368_v26, %v505_v25  ;;  %v386_v43 = vsub.f32 %v361_v31, %v500_v24 }
  0xc7   :  { %v119_v29 = vpop.f32.mrf.mxu0  ;;  %v197_v30 = vpop.f32.mrf.mxu1 }
  0xc8   :  { %v385_v39 = vsub.f32 %v361_v31, %v119_v29  ;;  %v387_v40 = vsub.f32 %v368_v26, %v197_v30 }
  0xc9   :  { %v278_v33 = vpop.f32.mrf.mxu0  ;;  %v351_v34 = vpop.f32.mrf.mxu1 }
  0xca   :  { %v372_v35 = vrot.slane %v278_v33, %v371_v27  ;;  %v392_v36 = vrot.slane %v278_v33, %v391_v28  ;;  %v376_v37 = vrot.slane %v351_v34, %v371_v27  ;;  %v396_v38 = vrot.slane %v351_v34, %v391_v28 }
  0xcb   :  { %v510_v41 = vpop.f32.mrf.mxu0  ;;  %v515_v42 = vpop.f32.mrf.mxu1 }
  0xcc   :  { %v380_v44 = vsub.f32 %v505_v25, %v376_v37  ;;  %v400_v45 = vsub.f32 %v388_v32, %v396_v38  ;;  %v379_v46 = vsub.f32 %v197_v30, %v376_v37  ;;  %v399_v47 = vsub.f32 %v387_v40, %v396_v38 }
  0xcd   :  { %v377_v48 = vsub.f32 %v119_v29, %v372_v35  ;;  %v397_v49 = vsub.f32 %v385_v39, %v392_v36  ;;  %v378_v50 = vsub.f32 %v500_v24, %v372_v35  ;;  %v398_v51 = vsub.f32 %v386_v43, %v392_v36 }
  0xce   :  { %v383_v52 = vand.u32 2147483647, %v379_v46  ;;  %v403_v53 = vand.u32 2147483647, %v399_v47  ;;  %v384_v57 = vand.u32 2147483647, %v380_v44 }
  0xcf   :  { %v381_v54 = vand.u32 2147483647, %v377_v48  ;;  %v401_v55 = vand.u32 2147483647, %v397_v49  ;;  %v404_v58 = vand.u32 2147483647, %v400_v45 }
  0xd0   :  { %v407_v56 = vadd.f32 %v403_v53, %v383_v52  ;;  %v382_v60 = vand.u32 2147483647, %v378_v50  ;;  %v402_v61 = vand.u32 2147483647, %v398_v51 }
  0xd1   :  { %v405_v59 = vadd.f32 %v401_v55, %v381_v54  ;;  %v408_v2 = vadd.f32 %v404_v58, %v384_v57 }
  0xd2   :  { %413 = vadd.xlane.f32.xlu1 %v407_v56  ;;  %v406_v3 = vadd.f32 %v402_v61, %v382_v60 }
  0xd3   :  { %409 = vadd.xlane.f32.xlu0 %v405_v59 }
  0xd6   :  { %415 = vadd.xlane.f32.xlu1 %v408_v2 }
  0xd7   :  { %411 = vadd.xlane.f32.xlu0 %v406_v3 }
  0xd8   :  { %531 = shalt.err (!%p528_p4)
}
  0xd9   :  { %457 = dma.vmem_to_hbm [thread:$0]  %s455_s29, 16, %s679_s4, [#allocation3]   ;;  %v422_v5 = vand.u32 127, %v369_v19  ;;  %vm432_vm3 = vcmask 130112   ;;  %vm443_vm4 = vcmask 1041409   ;;  %vm446_vm5 = vcmask 123904  }
  0xda   :  { %s567_s9 = smov [#allocation4]  }
  0xdb   :  { %v427_v6 = vadd.s32 4294967288, %v422_v5  ;;  %v425_v14 = vsub.s32 %v422_v5, %v654_v22  ;;  %s464_s10 = sshll.u32 %s567_s9, 4  ;;  %s465_s10 = int_to_ptr.vmem [resolvable:$true] %s464_s10 }
  0xdc   :  { %s540_s4 = scalar_lea.vmem %s465_s10, 32  ;;  %p545_p6 = scmp.lt.s32.totalorder %s465_s10, %s465_s10 }
  0xdd   :  { %v430_v16 = vsub.s32 %v427_v6, %v654_v22  ;;  %p541_p5 = scmp.ne.s32.totalorder %s465_s10, %s540_s4  ;;  %p546_p7 = scmp.lt.s32.totalorder %s540_s4, %s540_s4 }
  0xdf   :  { %p547_p8 = por %p546_p7, %p545_p6 }
  0xe1   :  { %p548_p9 = pnand %p547_p8, %p541_p5 }
 0x15b   :  { %v414_v7 = vpop.xlane.xlu1 %413 }
 0x15c   :  { %v410_v15 = vpop.xlane.xlu0 %409  ;;  %v437_v18 = vrot.slane %v414_v7, %v425_v14 }
 0x15d   :  { %v426_v23 = vrot.slane %v410_v15, %v425_v14 }
 0x15f   :  { %v416_v17 = vpop.xlane.xlu1 %415 }
 0x160   :  { %v441_v20 = vrot.slane %v416_v17, %v430_v16  ;;  %v412_v21 = vpop.xlane.xlu0 %411 }
 0x161   :  { %v431_v24 = vrot.slane %v412_v21, %v430_v16 }
 0x162   :  { %v442_v25 = vsel %vm432_vm3, %v441_v20, %v437_v18 }
 0x163   :  { %v433_v19 = vsel %vm432_vm3, %v431_v24, %v426_v23 }
 0x164   :  { %v444_v26 = vsel %vm443_vm4, %v442_v25, %v433_v19 }
 0x165   :  { %447 = vst.msk [vmem:[#allocation4] sm:$0x3] %vm446_vm5, %v444_v26 }
 0x166   :  { %551 = shalt.err (!%p548_p9)
}
 0x167   :  { %467 = dma.vmem_to_hbm [thread:$0]  %s465_s10, 32, %s680_s5, [#allocation5]  }
 0x168   :  { %560 = dma.done.wait [#allocation3], 16  }
 0x169   :  { %561 = vsyncadd [#allocation3], 4294967280 }
 0x16a   :  { %562 = dma.done.wait [#allocation5], 32  }
 0x16b   :  { %563 = vsyncadd [#allocation5], 4294967264 }
 0x16c   :  { %474 = vsyncpa [#allocation3], 1 }
 0x16d   :  { %475 = vsyncpa [#allocation5], 1 }

</bundles_post_ra>
